<compile_context>
chip_gen: v5e
topology: v5e:2x2
jax: 0.10.0
libtpu: 0.0.40
codegen_flags: <defaults>
</compile_context>

<pallas_src>
import functools
import math

import jax
import jax.numpy as jnp
from jax.experimental import pallas as pl
from jax.experimental.pallas import tpu as pltpu

# Large finite negative used instead of -inf so the online-softmax recurrence
# never produces inf - inf = nan.
_NEG_INF = -0.7 * float(jnp.finfo(jnp.float32).max)


def _flash_attn_kernel(q_ref, k_ref, v_ref, o_ref, m_sc, l_sc, acc_sc,
                       *, scale, causal, tq, tk):
    qi = pl.program_id(1)
    ki = pl.program_id(2)

    @pl.when(ki == 0)
    def _init():
        m_sc[...] = jnp.full_like(m_sc, _NEG_INF)
        l_sc[...] = jnp.zeros_like(l_sc)
        acc_sc[...] = jnp.zeros_like(acc_sc)

    def _compute():
        q = q_ref[0]                       # (tq, E)
        k = k_ref[0]                       # (tk, E)
        v = v_ref[0]                       # (tk, D)

        # scores tile: (tq, tk) on the MXU, f32 accumulation
        s = jax.lax.dot_general(q, k, (((1,), (1,)), ((), ())),
                                preferred_element_type=jnp.float32)
        s = s * scale

        if causal:
            row = qi * tq + jax.lax.broadcasted_iota(jnp.int32, (tq, tk), 0)
            col = ki * tk + jax.lax.broadcasted_iota(jnp.int32, (tq, tk), 1)
            s = jnp.where(col <= row, s, _NEG_INF)

        m_prev = m_sc[0]                                       # (tq, 1)
        m_new = jnp.maximum(m_prev, s.max(axis=-1, keepdims=True))
        alpha = jnp.exp(m_prev - m_new)
        p = jnp.exp(s - m_new)                                 # (tq, tk)

        l_sc[0] = alpha * l_sc[0] + p.sum(axis=-1, keepdims=True)
        acc_sc[0] = alpha * acc_sc[0] + jax.lax.dot_general(
            p.astype(v.dtype), v, (((1,), (0,)), ((), ())),
            preferred_element_type=jnp.float32)
        m_sc[0] = m_new

    if causal:
        # Skip kv blocks that lie strictly above the causal diagonal band.
        @pl.when(ki * tk <= qi * tq + (tq - 1))
        def _():
            _compute()
    else:
        _compute()

    @pl.when(ki == pl.num_programs(2) - 1)
    def _finalize():
        inv_l = pl.reciprocal(l_sc[0], approx=False)
        o_ref[0] = (acc_sc[0] * inv_l).astype(o_ref.dtype)


def full_attention(queries, keys, values, attn_mask=None, *,
                   mask_flag=True, scale=None,
                   block_q=128, block_k=128):
    """Pallas forward of FullAttention (eval mode).

    queries: (B, L, H, E); keys: (B, S, H, E); values: (B, S, H, D)
    Returns V: (B, L, H, D).
    """
    # TODO(synk): explicit attn_mask tensors are not supported; only the default
    # TriangularCausalMask (mask_flag=True, attn_mask=None) or no-mask paths.
    assert attn_mask is None
    # TODO(synk): training-mode attention dropout is not implemented (identity).
    B, L, H, E = queries.shape
    _, S, _, D = values.shape
    scale = float(scale) if scale is not None else 1.0 / math.sqrt(E)

    # Fold batch and heads into one "parallel" grid axis: (B, L, H, E) -> (B*H, L, E)
    q = jnp.transpose(queries, (0, 2, 1, 3)).reshape(B * H, L, E)
    k = jnp.transpose(keys, (0, 2, 1, 3)).reshape(B * H, S, E)
    v = jnp.transpose(values, (0, 2, 1, 3)).reshape(B * H, S, D)

    # Big, (8,128)-friendly tiles when the dims divide; otherwise the full
    # extent (always a legal block shape).
    tq = block_q if L % block_q == 0 else L
    tk = block_k if S % block_k == 0 else S

    kernel = functools.partial(_flash_attn_kernel, scale=scale,
                               causal=bool(mask_flag), tq=tq, tk=tk)

    grid = (B * H, L // tq, S // tk)
    out = pl.pallas_call(
        kernel,
        out_shape=jax.ShapeDtypeStruct((B * H, L, D), queries.dtype),
        grid=grid,
        in_specs=[
            pl.BlockSpec((1, tq, E), lambda bh, qi, ki: (bh, qi, 0)),
            pl.BlockSpec((1, tk, E), lambda bh, qi, ki: (bh, ki, 0)),
            pl.BlockSpec((1, tk, D), lambda bh, qi, ki: (bh, ki, 0)),
        ],
        out_specs=pl.BlockSpec((1, tq, D), lambda bh, qi, ki: (bh, qi, 0)),
        scratch_shapes=[
            pltpu.VMEM((1, tq, 1), jnp.float32),   # running max   m
            pltpu.VMEM((1, tq, 1), jnp.float32),   # running denom l
            pltpu.VMEM((1, tq, D), jnp.float32),   # running numerator acc
        ],
        compiler_params=pltpu.CompilerParams(
            dimension_semantics=("parallel", "parallel", "arbitrary")),
    )(q, k, v)

    # (B*H, L, D) -> (B, L, H, D)
    return jnp.transpose(out.reshape(B, H, L, D), (0, 2, 1, 3))


if __name__ == "__main__":
    key = jax.random.PRNGKey(0)
    kq, kk, kv = jax.random.split(key, 3)

    # small shapes consistent with FullAttention: (B, L, H, E) self-attention
    B, L, H, E = 2, 16, 4, 32
    S, D = L, E
    q = jax.random.normal(kq, (B, L, H, E), dtype=jnp.float32)
    k = jax.random.normal(kk, (B, S, H, E), dtype=jnp.float32)
    v = jax.random.normal(kv, (B, S, H, D), dtype=jnp.float32)

    out = full_attention(q, k, v, attn_mask=None, mask_flag=True)
    jax.block_until_ready(out)

    # plain-JAX reference (eval-mode FullAttention with TriangularCausalMask)
    scale = 1.0 / math.sqrt(E)
    scores = jnp.einsum('blhe,bshe->bhls', q, k)
    causal = jnp.triu(jnp.ones((L, S), dtype=bool), k=1)
    scores = jnp.where(causal[None, None], -jnp.inf, scores)
    A = jax.nn.softmax(scale * scores, axis=-1)
    ref = jnp.einsum('bhls,bshd->blhd', A, v)

    assert out.shape == (B, L, H, D)
    assert jnp.allclose(out, ref, atol=1e-3, rtol=1e-3)

    print("KERNEL_OK")
</pallas_src>

<mosaic_0001>
module attributes {stable_mosaic.version = 11 : i64} {
  func.func @_flash_attn_kernel(%arg0: i32, %arg1: i32, %arg2: i32, %arg3: memref<1x16x32xf32, #tpu.memory_space<vmem>>, %arg4: memref<1x16x32xf32, #tpu.memory_space<vmem>>, %arg5: memref<1x16x32xf32, #tpu.memory_space<vmem>>, %arg6: memref<1x16x32xf32, #tpu.memory_space<vmem>>, %arg7: memref<1x16x1xf32, #tpu.memory_space<vmem>>, %arg8: memref<1x16x1xf32, #tpu.memory_space<vmem>>, %arg9: memref<1x16x32xf32, #tpu.memory_space<vmem>>) attributes {dimension_semantics = [#tpu.dimension_semantics<parallel>, #tpu.dimension_semantics<parallel>, #tpu.dimension_semantics<arbitrary>], iteration_bounds = array<i64: 8, 1, 1>, scalar_prefetch = 0 : i64, scratch_operands = 3 : i64, tpu.core_type = #tpu.core_type<tc>, window_params = [{transform_indices = @transform_0, window_bounds = array<i64: 1, 16, 32>}, {transform_indices = @transform_1, window_bounds = array<i64: 1, 16, 32>}, {transform_indices = @transform_2, window_bounds = array<i64: 1, 16, 32>}, {transform_indices = @transform_3, window_bounds = array<i64: 1, 16, 32>}]} {
    %c0_i32 = arith.constant 0 : i32
    %0 = arith.cmpi eq, %arg2, %c0_i32 : i32
    %1 = arith.extui %0 : i1 to i32
    %c0_i32_0 = arith.constant 0 : i32
    %2 = arith.cmpi ne, %1, %c0_i32_0 : i32
    scf.if %2 {
      %cst = arith.constant -2.38197633E+38 : f32
      %12 = vector.broadcast %cst : f32 to vector<1x16x1xf32>
      %c0 = arith.constant 0 : index
      %c0_5 = arith.constant 0 : index
      %c0_6 = arith.constant 0 : index
      %13 = vector.load %arg7[%c0, %c0_5, %c0_6] : memref<1x16x1xf32, #tpu.memory_space<vmem>>, vector<1x16x1xf32>
      tpu.vector_store %arg7[%c0, %c0_5, %c0_6], %12 {strides = array<i32>} : memref<1x16x1xf32, #tpu.memory_space<vmem>>, vector<1x16x1xf32>,
      %cst_7 = arith.constant 0.000000e+00 : f32
      %14 = vector.broadcast %cst_7 : f32 to vector<1x16x1xf32>
      %c0_8 = arith.constant 0 : index
      %c0_9 = arith.constant 0 : index
      %c0_10 = arith.constant 0 : index
      %15 = vector.load %arg8[%c0_8, %c0_9, %c0_10] : memref<1x16x1xf32, #tpu.memory_space<vmem>>, vector<1x16x1xf32>
      tpu.vector_store %arg8[%c0_8, %c0_9, %c0_10], %14 {strides = array<i32>} : memref<1x16x1xf32, #tpu.memory_space<vmem>>, vector<1x16x1xf32>,
      %cst_11 = arith.constant 0.000000e+00 : f32
      %16 = vector.broadcast %cst_11 : f32 to vector<1x16x32xf32>
      %c0_12 = arith.constant 0 : index
      %c0_13 = arith.constant 0 : index
      %c0_14 = arith.constant 0 : index
      %17 = vector.load %arg9[%c0_12, %c0_13, %c0_14] : memref<1x16x32xf32, #tpu.memory_space<vmem>>, vector<1x16x32xf32>
      tpu.vector_store %arg9[%c0_12, %c0_13, %c0_14], %16 {strides = array<i32>} : memref<1x16x32xf32, #tpu.memory_space<vmem>>, vector<1x16x32xf32>,
    } else {
    }
    %c16_i32 = arith.constant 16 : i32
    %3 = arith.muli %arg2, %c16_i32 : i32
    %c16_i32_1 = arith.constant 16 : i32
    %4 = arith.muli %arg1, %c16_i32_1 : i32
    %c15_i32 = arith.constant 15 : i32
    %5 = arith.addi %4, %c15_i32 : i32
    %6 = arith.cmpi sle, %3, %5 : i32
    %7 = arith.extui %6 : i1 to i32
    %c0_i32_2 = arith.constant 0 : i32
    %8 = arith.cmpi ne, %7, %c0_i32_2 : i32
    scf.if %8 {
      %c0 = arith.constant 0 : index
      %c0_5 = arith.constant 0 : index
      %c0_6 = arith.constant 0 : index
      %12 = vector.load %arg3[%c0, %c0_5, %c0_6] : memref<1x16x32xf32, #tpu.memory_space<vmem>>, vector<1x16x32xf32>
      %13 = vector.shape_cast %12 : vector<1x16x32xf32> to vector<16x32xf32>
      %c0_7 = arith.constant 0 : index
      %c0_8 = arith.constant 0 : index
      %c0_9 = arith.constant 0 : index
      %14 = vector.load %arg4[%c0_7, %c0_8, %c0_9] : memref<1x16x32xf32, #tpu.memory_space<vmem>>, vector<1x16x32xf32>
      %15 = vector.shape_cast %14 : vector<1x16x32xf32> to vector<16x32xf32>
      %c0_10 = arith.constant 0 : index
      %c0_11 = arith.constant 0 : index
      %c0_12 = arith.constant 0 : index
      %16 = vector.load %arg5[%c0_10, %c0_11, %c0_12] : memref<1x16x32xf32, #tpu.memory_space<vmem>>, vector<1x16x32xf32>
      %17 = vector.shape_cast %16 : vector<1x16x32xf32> to vector<16x32xf32>
      %cst = arith.constant dense<0.000000e+00> : vector<16x16xf32>
      %18 = tpu.matmul %13, %15, %cst {dimension_numbers = #tpu.dot_dimension_numbers<[1], [1], [0], [0], [0, 0, 1, 0], [], []>} : vector<16x32xf32>, vector<16x32xf32>, vector<16x16xf32> -> vector<16x16xf32>
      %cst_13 = arith.constant 0.176776692 : f32
      %19 = vector.broadcast %cst_13 : f32 to vector<16x16xf32>
      %20 = arith.mulf %18, %19 : vector<16x16xf32>
      %c16_i32_14 = arith.constant 16 : i32
      %21 = arith.muli %arg1, %c16_i32_14 : i32
      %22 = tpu.iota {dimensions = array<i32: 0>} : vector<16x16xi32>
      %23 = vector.broadcast %21 : i32 to vector<16x16xi32>
      %24 = arith.addi %23, %22 : vector<16x16xi32>
      %c16_i32_15 = arith.constant 16 : i32
      %25 = arith.muli %arg2, %c16_i32_15 : i32
      %26 = tpu.iota {dimensions = array<i32: 1>} : vector<16x16xi32>
      %27 = vector.broadcast %25 : i32 to vector<16x16xi32>
      %28 = arith.addi %27, %26 : vector<16x16xi32>
      %29 = arith.cmpi sle, %28, %24 : vector<16x16xi32>
      %cst_16 = arith.constant -2.38197633E+38 : f32
      %30 = vector.broadcast %cst_16 : f32 to vector<16x16xf32>
      %31 = arith.select %29, %20, %30 : vector<16x16xi1>, vector<16x16xf32>
      %c0_17 = arith.constant 0 : index
      %c0_18 = arith.constant 0 : index
      %c0_19 = arith.constant 0 : index
      %32 = vector.load %arg7[%c0_17, %c0_18, %c0_19] : memref<1x16x1xf32, #tpu.memory_space<vmem>>, vector<1x16x1xf32>
      %33 = vector.shape_cast %32 : vector<1x16x1xf32> to vector<16x1xf32>
      %cst_20 = arith.constant dense<0xFF800000> : vector<16xf32>
      %34 = vector.multi_reduction <maximumf>, %31, %cst_20 [1] : vector<16x16xf32> to vector<16xf32>
      %35 = vector.shape_cast %34 : vector<16xf32> to vector<16x1xf32>
      %36 = arith.maximumf %33, %35 : vector<16x1xf32>
      %37 = arith.subf %33, %36 : vector<16x1xf32>
      %38 = math.exp %37 : vector<16x1xf32>
      %39 = vector.broadcast %36 : vector<16x1xf32> to vector<16x16xf32>
      %40 = arith.subf %31, %39 : vector<16x16xf32>
      %41 = math.exp %40 : vector<16x16xf32>
      %c0_21 = arith.constant 0 : index
      %c0_22 = arith.constant 0 : index
      %c0_23 = arith.constant 0 : index
      %42 = vector.load %arg8[%c0_21, %c0_22, %c0_23] : memref<1x16x1xf32, #tpu.memory_space<vmem>>, vector<1x16x1xf32>
      %43 = vector.shape_cast %42 : vector<1x16x1xf32> to vector<16x1xf32>
      %44 = arith.mulf %38, %43 : vector<16x1xf32>
      %cst_24 = arith.constant dense<0.000000e+00> : vector<16xf32>
      %45 = vector.multi_reduction <add>, %41, %cst_24 [1] : vector<16x16xf32> to vector<16xf32>
      %46 = vector.shape_cast %45 : vector<16xf32> to vector<16x1xf32>
      %47 = arith.addf %44, %46 : vector<16x1xf32>
      %c0_25 = arith.constant 0 : index
      %c0_26 = arith.constant 0 : index
      %c0_27 = arith.constant 0 : index
      %48 = vector.load %arg8[%c0_25, %c0_26, %c0_27] : memref<1x16x1xf32, #tpu.memory_space<vmem>>, vector<1x16x1xf32>
      %49 = vector.shape_cast %48 : vector<1x16x1xf32> to vector<16x1xf32>
      %50 = vector.shape_cast %47 : vector<16x1xf32> to vector<1x16x1xf32>
      tpu.vector_store %arg8[%c0_25, %c0_26, %c0_27], %50 {strides = array<i32>} : memref<1x16x1xf32, #tpu.memory_space<vmem>>, vector<1x16x1xf32>,
      %c0_28 = arith.constant 0 : index
      %c0_29 = arith.constant 0 : index
      %c0_30 = arith.constant 0 : index
      %51 = vector.load %arg9[%c0_28, %c0_29, %c0_30] : memref<1x16x32xf32, #tpu.memory_space<vmem>>, vector<1x16x32xf32>
      %52 = vector.shape_cast %51 : vector<1x16x32xf32> to vector<16x32xf32>
      %53 = vector.broadcast %38 : vector<16x1xf32> to vector<16x32xf32>
      %54 = arith.mulf %53, %52 : vector<16x32xf32>
      %cst_31 = arith.constant dense<0.000000e+00> : vector<16x32xf32>
      %55 = tpu.matmul %41, %17, %cst_31 {dimension_numbers = #tpu.dot_dimension_numbers<[1], [0], [0], [1], [0, 0, 1, 1], [], []>} : vector<16x16xf32>, vector<16x32xf32>, vector<16x32xf32> -> vector<16x32xf32>
      %56 = arith.addf %54, %55 : vector<16x32xf32>
      %c0_32 = arith.constant 0 : index
      %c0_33 = arith.constant 0 : index
      %c0_34 = arith.constant 0 : index
      %57 = vector.load %arg9[%c0_32, %c0_33, %c0_34] : memref<1x16x32xf32, #tpu.memory_space<vmem>>, vector<1x16x32xf32>
      %58 = vector.shape_cast %57 : vector<1x16x32xf32> to vector<16x32xf32>
      %59 = vector.shape_cast %56 : vector<16x32xf32> to vector<1x16x32xf32>
      tpu.vector_store %arg9[%c0_32, %c0_33, %c0_34], %59 {strides = array<i32>} : memref<1x16x32xf32, #tpu.memory_space<vmem>>, vector<1x16x32xf32>,
      %c0_35 = arith.constant 0 : index
      %c0_36 = arith.constant 0 : index
      %c0_37 = arith.constant 0 : index
      %60 = vector.load %arg7[%c0_35, %c0_36, %c0_37] : memref<1x16x1xf32, #tpu.memory_space<vmem>>, vector<1x16x1xf32>
      %61 = vector.shape_cast %60 : vector<1x16x1xf32> to vector<16x1xf32>
      %62 = vector.shape_cast %36 : vector<16x1xf32> to vector<1x16x1xf32>
      tpu.vector_store %arg7[%c0_35, %c0_36, %c0_37], %62 {strides = array<i32>} : memref<1x16x1xf32, #tpu.memory_space<vmem>>, vector<1x16x1xf32>,
    } else {
    }
    %c0_i32_3 = arith.constant 0 : i32
    %9 = arith.cmpi eq, %arg2, %c0_i32_3 : i32
    %10 = arith.extui %9 : i1 to i32
    %c0_i32_4 = arith.constant 0 : i32
    %11 = arith.cmpi ne, %10, %c0_i32_4 : i32
    scf.if %11 {
      %c0 = arith.constant 0 : index
      %c0_5 = arith.constant 0 : index
      %c0_6 = arith.constant 0 : index
      %12 = vector.load %arg8[%c0, %c0_5, %c0_6] : memref<1x16x1xf32, #tpu.memory_space<vmem>>, vector<1x16x1xf32>
      %13 = vector.shape_cast %12 : vector<1x16x1xf32> to vector<16x1xf32>
      %14 = tpu.reciprocal %13 : vector<16x1xf32> -> vector<16x1xf32>
      %c0_7 = arith.constant 0 : index
      %c0_8 = arith.constant 0 : index
      %c0_9 = arith.constant 0 : index
      %15 = vector.load %arg9[%c0_7, %c0_8, %c0_9] : memref<1x16x32xf32, #tpu.memory_space<vmem>>, vector<1x16x32xf32>
      %16 = vector.shape_cast %15 : vector<1x16x32xf32> to vector<16x32xf32>
      %17 = vector.broadcast %14 : vector<16x1xf32> to vector<16x32xf32>
      %18 = arith.mulf %16, %17 : vector<16x32xf32>
      %c0_10 = arith.constant 0 : index
      %c0_11 = arith.constant 0 : index
      %c0_12 = arith.constant 0 : index
      %19 = vector.load %arg6[%c0_10, %c0_11, %c0_12] : memref<1x16x32xf32, #tpu.memory_space<vmem>>, vector<1x16x32xf32>
      %20 = vector.shape_cast %19 : vector<1x16x32xf32> to vector<16x32xf32>
      %21 = vector.shape_cast %18 : vector<16x32xf32> to vector<1x16x32xf32>
      tpu.vector_store %arg6[%c0_10, %c0_11, %c0_12], %21 {strides = array<i32>} : memref<1x16x32xf32, #tpu.memory_space<vmem>>, vector<1x16x32xf32>,
    } else {
    }
    return
  }
  func.func @transform_0(%arg0: i32, %arg1: i32, %arg2: i32) -> (i32, i32, i32) {
    %c0_i32 = arith.constant 0 : i32
    %c0_i32_0 = arith.constant 0 : i32
    return %arg0, %arg1, %c0_i32 : i32, i32, i32
  }
  func.func @transform_1(%arg0: i32, %arg1: i32, %arg2: i32) -> (i32, i32, i32) {
    %c0_i32 = arith.constant 0 : i32
    %c0_i32_0 = arith.constant 0 : i32
    return %arg0, %arg2, %c0_i32 : i32, i32, i32
  }
  func.func @transform_2(%arg0: i32, %arg1: i32, %arg2: i32) -> (i32, i32, i32) {
    %c0_i32 = arith.constant 0 : i32
    %c0_i32_0 = arith.constant 0 : i32
    return %arg0, %arg2, %c0_i32 : i32, i32, i32
  }
  func.func @transform_3(%arg0: i32, %arg1: i32, %arg2: i32) -> (i32, i32, i32) {
    %c0_i32 = arith.constant 0 : i32
    %c0_i32_0 = arith.constant 0 : i32
    return %arg0, %arg1, %c0_i32 : i32, i32, i32
  }
}

</mosaic_0001>

<bundles_post_ra>
// kernel: tpu_custom_call.1
= control target key start
LH: loop header
LB: loop body
LE: loop exit
PB: predicated region body
PF: predicated region fallthrough
CT: control target
= control target key end

     0   :  { %s1213_s0 = inlined_call_operand.hbm [shape: f32[8,16,32], index: 0, kind: input, shape index: {}]   ;;  %s1214_s1 = inlined_call_operand.hbm [shape: f32[8,16,32], index: 1, kind: input, shape index: {}]   ;;  %s1215_s2 = inlined_call_operand.hbm [shape: f32[8,16,32], index: 2, kind: input, shape index: {}]   ;;  %s1216_s3 = inlined_call_operand.hbm [shape: f32[8,16,32], index: 3, kind: output, shape index: {}]  }
   0x1   :  { %1221 = sst [smem:[#allocation20_spill]] %s1214_s1 }
   0x2   :  { %8 = vsyncpa [#allocation6], 0 }
   0x3   :  { %10 = vsyncpa [#allocation6 + $0x1], 0 }
   0x4   :  { %11 = vsyncpa [#allocation9], 0 }
   0x5   :  { %13 = vsyncpa [#allocation9 + $0x1], 0 }
   0x6   :  { %14 = vsyncpa [#allocation7], 0 }
   0x7   :  { %16 = vsyncpa [#allocation7 + $0x1], 0  ;;  %s1026_s12 = smov 0   ;;  %s1028_s13 = smov 0  }
   0x8   :  { %s1030_s14 = smov 0   ;;  %s1032_s15 = smov 0  }
   0x9   :  { %s1034_s16 = smov 0   ;;  %s1036_s17 = smov 0  }
   0xa LB: > { %1222 = sst [smem:[#allocation15_spill]] %s985_s14  ;;  %s1057_s18 = sadd.s32 4294967295, %s997_s17   ;;  %s997_s17 = sphi %s1036_s17, %s22_s17   ;;  %s993_s16 = sphi %s1034_s16, %s1238_s16   ;;  %s989_s15 = sphi %s1032_s15, %s1237_s15   ;;  %s985_s14 = sphi %s1030_s14, %s1241_s14   ;;  %s981_s13 = sphi %s1028_s13, %s1240_s13   ;;  %s977_s12 = sphi %s1026_s12, %s1239_s12  }
   0xb   : > { %1223 = sst [smem:[#allocation16_spill]] %s993_s16  ;;  %s691_s19 = sadd.s32 4294967294, %s997_s17  }
   0xc   : > { %s41_s20 = sadd.s32 1, %s993_s16  ;;  %s50_s21 = sadd.s32 1, %s985_s14 }
   0xd   : > { %p43_p0 = scmp.ge.s32.totalorder %s41_s20, 8  ;;  %p57_p1 = scmp.ne.s32.totalorder %s985_s14, %s981_s13 }
   0xe   : > { %p58_p2 = scmp.eq.s32.totalorder %s997_s17, 0  ;;  %p63_p3 = scmp.ne.s32.totalorder %s981_s13, %s977_s12 }
   0xf   : > { %s1243_s20 = smov (%p43_p0, %s41_s20), 0  ;;  %p64_p5 = scmp.eq.s32.totalorder %s1057_s18, 0 }
  0x10   : > { %1224 = sst [smem:[#allocation17_spill]] %s1243_s20  ;;  %p1069_p4 = por %p58_p2, %p57_p1 }
  0x11   : > { %s45_s23 = ssub.s32 %s993_s16, %s1243_s20  ;;  %p145_p6 = scmp.eq.s32.totalorder %s1057_s18, 7 }
  0x12   : > { %p48_p7 = scmp.eq.s32.totalorder %s45_s23, 0  ;;  %p1077_p8 = por %p64_p5, %p63_p3 }
  0x13   : > { %p1081_p9 = por %p145_p6, %p57_p1  ;;  %p151_p10 = scmp.eq.s32.totalorder %s691_s19, 7 }
  0x14   : > { %s1086_s26 = scalar_select %p48_p7, %s985_s14, %s50_s21  }
  0x15   : > { %p1088_p11 = por %p151_p10, %p63_p3  ;;  %p749_p12 = scmp.lt.s32.totalorder %s997_s17, 8 }
  0x16   : > { %1228 = sst [smem:[#allocation18_spill]] %s1086_s26  ;;  %s171_s28 = sand.u32 1, %s985_s14  }
  0x17   : > { %s1229_s27 = scalar_select %p1088_p11, 1, 0 }
  0x18   : > { %s1094_s29 = sshll.u32 %s171_s28, 4  ;;  %s719_s30 = sshll.u32 %s993_s16, 4 }
  0x19   : > { %1230 = sst [smem:[#allocation19_spill]] %s1229_s27  ;;  %p1099_p13 = pnand %p749_p12, %p1069_p4 }
  0x1a   : > { %s195_s5 = sand.u32 1, %s997_s17   ;;  %s1232_s1 = sld [smem:[#allocation20_spill]] }
  0x1b   : > { %s199_s10 = scalar_lea.vmem [#allocation8], %s1094_s29  ;;  %s196_s19 = scalar_lea.sflag [#allocation9], %s195_s5 }
  0x1c   : > { %s209_s11 = sshll.u32 %s199_s10, 4  ;;  %s999_s21 = smov 128   ;;  %s210_s11 = int_to_ptr.vmem [resolvable:$true] %s209_s11 }
  0x1d   : > { %s1000_s22 = smov 8   ;;  %p703_p0 = scmp.ge.s32.totalorder %s997_s17, 1 }
  0x1e   : > { %p241_p1 = scmp.lt.s32.totalorder %s997_s17, 9  ;;  %s172_s5 = scalar_lea.sflag [#allocation6], %s171_s28 }
  0x1f   : > { %s230_s16 = scalar_lea.hbm %s1215_s2, %s719_s30  ;;  %s223_s14 = scalar_lea.vmem [#allocation10], %s1094_s29 }
  0x20   : > { %s206_s8 = scalar_lea.hbm %s1232_s1, %s719_s30  ;;  %p1112_p2 = pnand %p703_p0, %p241_p1 }
  0x21   : > { %s207_s9 = sshll.u32 %s206_s8, 4  ;;  %s182_s8 = scalar_lea.hbm %s1213_s0, %s719_s30  ;;  %s208_s9 = int_to_ptr.hbm [resolvable:$true] %s207_s9 }
  0x22   : > { %741 = dma.hbm_to_vmem [thread:$0]  (!%p1099_p13), %s208_s9, 256, %s210_s11, %s196_s19, %s999_s21, %s999_s21, %s1000_s22  }
  0x23   : > { %s183_s10 = sshll.u32 %s182_s8, 4  ;;  %s175_s1 = scalar_lea.vmem [#allocation5], %s1094_s29  ;;  %s184_s10 = int_to_ptr.hbm [resolvable:$true] %s183_s10 }
  0x24   : > { %s185_s20 = sshll.u32 %s175_s1, 4  ;;  %s231_s26 = sshll.u32 %s230_s16, 4  ;;  %s186_s20 = int_to_ptr.vmem [resolvable:$true] %s185_s20  ;;  %s232_s26 = int_to_ptr.hbm [resolvable:$true] %s231_s26 }
  0x25   : > { %738 = dma.hbm_to_vmem [thread:$0]  (!%p1099_p13), %s184_s10, 256, %s186_s20, %s172_s5, %s999_s21, %s999_s21, %s1000_s22  }
  0x26   : > { %s233_s27 = sshll.u32 %s223_s14, 4  ;;  %245 = sbr.rel (%p1112_p2) target bundleno = 716 (0x2cc), region = 32  ;;  %s234_s27 = int_to_ptr.vmem [resolvable:$true] %s233_s27 }
  0x27   : > { %744 = dma.hbm_to_vmem [thread:$0]  (!%p1099_p13), %s232_s26, 256, %s234_s27, %s196_s19, %s999_s21, %s999_s21, %s1000_s22  }
  0x28   : > { %s1131_s1 = sand.u32 (!%p1112_p2), 1, %s981_s13  }
  0x29   : > { %s1134_s20 = sshll.u32 (!%p1112_p2), %s1131_s1, 4  ;;  %s248_s28 = scalar_lea.sflag (!%p1112_p2), [#allocation6], %s1131_s1 }
  0x2a   : > { %s251_s16 = scalar_lea.vmem (!%p1112_p2), [#allocation5], %s1134_s20 }
  0x2b   : > { %964 = dma.done.wait (%p1077_p8), %s248_s28, 256  }
  0x2c   : > { %966 = vsyncadd (%p1077_p8), %s248_s28, 4294967040  ;;  %s257_s14 = sand.u32 1, %s1057_s18   ;;  %s261_s27 = scalar_lea.vmem [#allocation8], %s1134_s20 }
  0x2d   : > { %s258_s26 = scalar_lea.sflag [#allocation9], %s257_s14 }
  0x2e   : > { %968 = dma.done.wait (%p1077_p8), %s258_s26, 512  }
  0x2f   : > { %970 = vsyncadd (%p1077_p8), %s258_s26, 4294966784  ;;  %vm318_vm0 = vcmask 261120   ;;  %v331_v0 = vld [vmem:[%s261_s27 + $0x8] sm:$0xff]  ;;  %v330_v1 = vld [vmem:[%s261_s27] sm:$0xff]  ;;  %vm313_vm1 = vcmask 7168   ;;  %v372_v5 = vlaneseq  ;;  %vm388_vm3 = vcmask 130048  }
  0x30   : > { %723 = vmatpush.xpose.msk.msra.mxu2 %vm318_vm0, %v331_v0  ;;  %708 = vmatpush.xpose.msk.msra.mxu0 %vm318_vm0, %v331_v0  ;;  %v329_v2 = vld [vmem:[%s251_s16 + $0x8] sm:$0xff]  ;;  %v328_v3 = vld [vmem:[%s251_s16] sm:$0xff]  ;;  %v1001_v4 = vmov -2.3819763e+38   ;;  %v1002_v17 = vmov 0   ;;  %v1003_v18 = vmov 0.0  }
  0x31   : > { %315 = vst.msk [vmem:[#allocation2 + $0x8] sm:$0xff] %vm313_vm1, %v1001_v4  ;;  %v373_v6 = vshrl.u32 %v372_v5, 7  ;;  %v379_v8 = vand.u32 127, %v372_v5  ;;  %806 = vset.pattern.permute.xlu1 %v1002_v17  ;;  %807 = vset.pattern.permute.xlu0 %v1002_v17  ;;  %s271_s18 = scalar_lea.vmem [#allocation10], %s1134_s20  ;;  %s304_s24 = scalar_lea.vmem [#allocation11], %s1134_s20 }
  0x32   : > { %314 = vst.msk [vmem:[#allocation2] sm:$0xff] %vm313_vm1, %v1001_v4  ;;  %808 = vset.pattern.permute.xlu2 %v1002_v17  ;;  %v333_v31 = vld [vmem:[%s271_s18 + $0x8] sm:$0xff]  ;;  %v332_v32 = vld [vmem:[%s271_s18] sm:$0xff]  ;;  %s722_s29 = sshll.u32 %s989_s15, 4  ;;  %s548_s21 = sshll.u32 %s304_s24, 4  ;;  %s549_s21 = int_to_ptr.vmem [resolvable:$true] %s548_s21 }
  0x33   : > { %v374_v7 = vadd.s32 8, %v373_v6  ;;  %vm382_vm4 = vcmp.le.s32.totalorder %v379_v8, %v373_v6  ;;  %320 = vst.msk [vmem:[#allocation4 + $0x8] sm:$0xff] %vm318_vm0, %v1003_v18  ;;  %725 = vmatpush.msra.mxu3 %v333_v31  ;;  %468 = vmatpush.msra.mxu1 %v333_v31  ;;  %s547_s19 = scalar_lea.hbm %s1216_s3, %s722_s29  ;;  %s534_s23 = scalar_lea.sflag [#allocation7], %s1131_s1 }
  0x34   : > { %724 = vmatpush.xpose.msk.msra.mxu2 %vm318_vm0, %v330_v1  ;;  %709 = vmatpush.xpose.msk.msra.mxu0 %vm318_vm0, %v330_v1  ;;  %316 = vst.msk [vmem:[#allocation3] sm:$0xff] %vm313_vm1, %v1003_v18  ;;  %s550_s22 = sshll.u32 %s547_s19, 4  ;;  %s931_s10 = scalar_lea.hbm %s1216_s3, 128  ;;  %s551_s22 = int_to_ptr.hbm [resolvable:$true] %s550_s22 }
  0x35   : > { %vm383_vm2 = vcmp.le.s32.totalorder %v379_v8, %v374_v7  ;;  %317 = vst.msk [vmem:[#allocation3 + $0x8] sm:$0xff] %vm313_vm1, %v1003_v18  ;;  %726 = vmatpush.msra.mxu3 %v332_v32  ;;  %469 = vmatpush.msra.mxu1 %v332_v32  ;;  %s925_s6 = sshra.s32 %s551_s22, 4  ;;  %s926_s6 = int_to_ptr.hbm [resolvable:$true] %s925_s6 }
  0x36   : > { %319 = vst.msk [vmem:[#allocation4] sm:$0xff] %vm318_vm0, %v1003_v18  ;;  %s927_s7 = scalar_lea.hbm %s926_s6, 16  ;;  %p932_p6 = scmp.lt.s32.totalorder %s926_s6, %s1216_s3 }
  0x37   : > { %711 = vmatmul.msk.f32.vlgmr.msra.gmra.mxu2 %vm318_vm0, %v329_v2  ;;  %710 = vmatmul.msk.f32.vlgmr.msra.gmra.mxu0 %vm318_vm0, %v328_v3  ;;  %p928_p3 = scmp.ne.s32.totalorder %s926_s6, %s927_s7  ;;  %p933_p7 = scmp.lt.s32.totalorder %s931_s10, %s927_s7 }
  0x38   : > { %v387_v19 = vld [vmem:[#allocation2 + $0x8] sm:$0xff] }
  0x39   : > { %v386_v23 = vld [vmem:[#allocation2] sm:$0xff]  ;;  %p929_p4 = pnand %p928_p3, %p1081_p9  ;;  %p934_p8 = por %p933_p7, %p932_p6 }
  0x3a   : > { %v435_v47 = vld [vmem:[#allocation4 + $0x8] sm:$0xff] }
  0x3b   : > { %v419_v43 = vld [vmem:[#allocation3] sm:$0xff]  ;;  %p930_p5 = pneg %p929_p4 }
  0x3c   : > { %v420_v49 = vld [vmem:[#allocation3 + $0x8] sm:$0xff] }
  0x3d   : > { %v434_v50 = vld [vmem:[#allocation4] sm:$0xff]  ;;  %p935_p10 = pnand %p934_p8, %p930_p5 }
  0xb4   : > { %v364_v10 = vpop.f32.mrf.mxu0 }
  0xb5   : > { %v370_v13 = vmul.f32 0.17677669, %v364_v10 }
  0xb7   : > { %v384_v15 = vsel %vm382_vm4, %v370_v13, -2.3819763e+38 }
  0xb8   : > { %v389_v16 = vsel %vm388_vm3, %v384_v15, -inf }
  0xba   : > { %v367_v9 = vpop.f32.mrf.mxu2 }
  0xbb   : > { %v371_v11 = vmul.f32 0.17677669, %v367_v9 }
  0xbd   : > { %v385_v12 = vsel %vm383_vm2, %v371_v11, -2.3819763e+38 }
  0xbe   : > { %v392_v14 = vsel %vm388_vm3, %v385_v12, -inf }
  0xbf   : > { %393 = vmax.xlane.f32.xlu0 %v392_v14 }
  0xc7   : > { %390 = vmax.xlane.f32.xlu0 %v389_v16 }
 0x132   : > { %v394_v20 = vpop.xlane.xlu0 %393 }
 0x133   : > { %v396_v21 = vmax.f32 %v387_v19, %v394_v20 }
 0x135   : > { %482 = vst.msk [vmem:[#allocation2 + $0x8] sm:$0xff] %vm313_vm1, %v396_v21  ;;  %410 = vperm.xlu1 %806, %v396_v21   ;;  %v398_v22 = vsub.f32 %v387_v19, %v396_v21 }
 0x137   : > { %v401_v24 = vmul.f32 1.442695, %v398_v22 }
 0x139   : > { %809 = vpow2.f32 %v401_v24 }
 0x13a   : > { %v391_v25 = vpop.xlane.xlu0 %390 }
 0x13b   : > { %v395_v26 = vmax.f32 %v386_v23, %v391_v25 }
 0x13d   : > { %v397_v27 = vsub.f32 %v386_v23, %v395_v26  ;;  %481 = vst.msk [vmem:[#allocation2] sm:$0xff] %vm313_vm1, %v395_v26  ;;  %405 = vperm.xlu1 %806, %v395_v26  }
 0x13f   : > { %v399_v28 = vmul.f32 1.442695, %v397_v27  ;;  %v810_v29 = vpop.eup %809 }
 0x140   : > { %v422_v54 = vmul.f32 %v810_v29, %v420_v49 }
 0x141   : > { %811 = vpow2.f32 %v399_v28 }
 0x145   : > { %443 = vperm.xlu1 %806, %v810_v29  }
 0x147   : > { %v812_v30 = vpop.eup %811 }
 0x148   : > { %438 = vperm.xlu0 %807, %v812_v30   ;;  %v421_v44 = vmul.f32 %v812_v30, %v419_v43 }
 0x1a7   : > { %v411_v33 = vpop.permute.xlu1 %410 }
 0x1a8   : > { %v414_v34 = vsub.f32 %v385_v12, %v411_v33 }
 0x1aa   : > { %v417_v35 = vmul.f32 1.442695, %v414_v34 }
 0x1ac   : > { %813 = vpow2.f32 %v417_v35 }
 0x1af   : > { %v406_v36 = vpop.permute.xlu1 %405 }
 0x1b0   : > { %v413_v37 = vsub.f32 %v384_v15, %v406_v36 }
 0x1b2   : > { %v814_v38 = vpop.eup %813  ;;  %v415_v39 = vmul.f32 1.442695, %v413_v37 }
 0x1b3   : > { %713 = vmatmul.msk.f32.vlgmr.msra.gmra.mxu3 %vm388_vm3, %v814_v38  ;;  %v426_v42 = vsel %vm388_vm3, %v814_v38, 0.0 }
 0x1b4   : > { %815 = vpow2.f32 %v415_v39 }
 0x1b7   : > { %v444_v48 = vpop.permute.xlu1 %443 }
 0x1b8   : > { %v447_v52 = vmul.f32 %v444_v48, %v435_v47 }
 0x1ba   : > { %v816_v40 = vpop.eup %815  ;;  %v439_v51 = vpop.permute.xlu0 %438 }
 0x1bb   : > { %712 = vmatmul.msk.f32.vlgmr.msra.gmra.mxu1 %vm388_vm3, %v816_v40  ;;  %v423_v41 = vsel %vm388_vm3, %v816_v40, 0.0  ;;  %v446_v55 = vmul.f32 %v439_v51, %v434_v50 }
 0x1bc   : > { %424 = vadd.xlane.f32.xlu2 %v423_v41 }
 0x1c4   : > { %427 = vadd.xlane.f32.xlu2 %v426_v42 }
 0x22f   : > { %v425_v45 = vpop.xlane.xlu2 %424 }
 0x230   : > { %v429_v46 = vadd.f32 %v425_v45, %v421_v44 }
 0x232   : > { %432 = vst.msk [vmem:[#allocation3] sm:$0xff] %vm313_vm1, %v429_v46 }
 0x236   : > { %v474_v53 = vpop.f32.mrf.mxu3 }
 0x237   : > { %v478_v56 = vadd.f32 %v474_v53, %v447_v52  ;;  %v428_v57 = vpop.xlane.xlu2 %427 }
 0x238   : > { %v430_v58 = vadd.f32 %v428_v57, %v422_v54  ;;  %v471_v59 = vpop.f32.mrf.mxu1 }
 0x239   : > { %480 = vst.msk [vmem:[#allocation4 + $0x8] sm:$0xff] %vm318_vm0, %v478_v56  ;;  %v477_v60 = vadd.f32 %v471_v59, %v446_v55  ;;  %v486_v61 = vld [vmem:[#allocation3] sm:$0xff] }
 0x23a   : > { %433 = vst.msk [vmem:[#allocation3 + $0x8] sm:$0xff] %vm313_vm1, %v430_v58  ;;  %817 = vrcp.f32 %v486_v61  ;;  %v499_v2 = vand.u32 2147483648, %v486_v61  ;;  %v497_v4 = vand.u32 2147483647, %v486_v61  ;;  %vm493_vm6 = vweird.f32 %v486_v61 }
 0x23b   : > { %479 = vst.msk [vmem:[#allocation4] sm:$0xff] %vm318_vm0, %v477_v60 }
 0x23c   : > { %v500_v7 = vor.u32 1.1754944e-38, %v499_v2  ;;  %vm498_vm8 = vcmp.eq.f32.partialorder %v497_v4, 8.507059e+37 }
 0x240   : > { %v818_v62 = vpop.eup %817  ;;  %v517_v22 = vld [vmem:[#allocation4 + $0x8] sm:$0xff] }
 0x241   : > { %v489_v63 = vmul.f32 %v818_v62, %v486_v61  ;;  %v487_v0 = vld [vmem:[#allocation3 + $0x8] sm:$0xff]  ;;  %vm494_vm5 = vweird.f32 %v818_v62 }
 0x242   : > { %819 = vrcp.f32 %v487_v0  ;;  %vm495_vm7 = vmor %vm493_vm6, %vm494_vm5  ;;  %v513_v12 = vand.u32 2147483648, %v487_v0  ;;  %v511_v14 = vand.u32 2147483647, %v487_v0  ;;  %vm507_vm10 = vweird.f32 %v487_v0  ;;  %v516_v19 = vld [vmem:[#allocation4] sm:$0xff] }
 0x243   : > { %v490_v1 = vsub.f32 1.0, %v489_v63 }
 0x244   : > { %v514_v16 = vor.u32 1.1754944e-38, %v513_v12  ;;  %vm512_vm12 = vcmp.eq.f32.partialorder %v511_v14, 8.507059e+37 }
 0x245   : > { %v491_v3 = vmul.f32 %v818_v62, %v490_v1 }
 0x247   : > { %v492_v5 = vadd.f32 %v818_v62, %v491_v3 }
 0x248   : > { %v820_v6 = vpop.eup %819 }
 0x249   : > { %v496_v8 = vsel %vm495_vm7, %v818_v62, %v492_v5  ;;  %v503_v9 = vmul.f32 %v820_v6, %v487_v0  ;;  %vm508_vm9 = vweird.f32 %v820_v6 }
 0x24a   : > { %v501_v10 = vsel %vm498_vm8, %v500_v7, %v496_v8  ;;  %vm509_vm11 = vmor %vm507_vm10, %vm508_vm9 }
 0x24b   : > { %520 = vperm.xlu2 %808, %v501_v10   ;;  %v504_v11 = vsub.f32 1.0, %v503_v9 }
 0x24d   : > { %v505_v13 = vmul.f32 %v820_v6, %v504_v11 }
 0x24f   : > { %v506_v15 = vadd.f32 %v820_v6, %v505_v13 }
 0x251   : > { %v510_v17 = vsel %vm509_vm11, %v820_v6, %v506_v15 }
 0x252   : > { %v515_v18 = vsel %vm512_vm12, %v514_v16, %v510_v17 }
 0x253   : > { %525 = vperm.xlu1 %806, %v515_v18  }
 0x2a5   : > { %v521_v20 = vpop.permute.xlu2 %520 }
 0x2a6   : > { %v528_v21 = vmul.f32 %v521_v20, %v516_v19 }
 0x2a8   : > { %531 = vst.msk [vmem:[%s304_s24] sm:$0xff] %vm318_vm0, %v528_v21 }
 0x2c5   : > { %v526_v23 = vpop.permute.xlu1 %525 }
 0x2c6   : > { %v529_v24 = vmul.f32 %v526_v23, %v517_v22 }
 0x2c8   : > { %532 = vst.msk [vmem:[%s304_s24 + $0x8] sm:$0xff] %vm318_vm0, %v529_v24 }
 0x2c9   : > { %938 = shalt.err (!%p935_p10)
}
 0x2ca   : > { %s1004_s11 = smov 128   ;;  %s1005_s1 = smov 8  }
 0x2cb   : > { %733 = dma.vmem_to_hbm [thread:$0]  (%p1081_p9), %s549_s21, 256, %s551_s22, %s534_s23, %s1004_s11, %s1004_s11, %s1005_s1  }
 0x2cc PF: > { %p750_p12 = scmp.ge.s32.totalorder %s997_s17, 2  ;;  %s565_s28 = sand.u32 1, %s977_s12  }
 0x2cd   : > { %s566_s16 = scalar_lea.sflag [#allocation7], %s565_s28 }
 0x2ce   : > { %p746_p13 = pnand %p750_p12, %p1088_p11 }
 0x2d0   : > { %p747_p0 = pneg %p746_p13 }
 0x2d2   : > { %972 = dma.done.wait (%p747_p0), %s566_s16, 256  }
 0x2d3   : > { %974 = vsyncadd (%p747_p0), %s566_s16, 4294967040  ;;  %s22_s17 = sadd.s32 1, %s997_s17   ;;  %s1235_s14 = sld [smem:[#allocation15_spill]] }
 0x2d4   : > { %p19_p1 = scmp.ge.s32.totalorder %s22_s17, 10   ;;  %s1236_s26 = sld [smem:[#allocation18_spill]] }
 0x2d5   : > { %s1237_s15 = sld [smem:[#allocation16_spill]]  ;;  %s1239_s12 = smov %s981_s13 }
 0x2d6   : > { %s1238_s16 = sld [smem:[#allocation17_spill]]  ;;  %21 = sbr.rel (!%p19_p1) target bundleno = 10 (0xa), region = 113 }
 0x2d9   : > { %s1240_s13 = smov %s1235_s14 }
 0x2da   : > { %s1241_s14 = smov %s1236_s26 }
 0x2db   :  { %572 = vsyncpa [#allocation6], 1 }
 0x2dc   :  { %574 = vsyncpa [#allocation6 + $0x1], 1 }
 0x2dd   :  { %575 = vsyncpa [#allocation9], 1 }
 0x2de   :  { %577 = vsyncpa [#allocation9 + $0x1], 1 }
 0x2df   :  { %578 = vsyncpa [#allocation7], 1 }
 0x2e0   :  { %580 = vsyncpa [#allocation7 + $0x1], 1 }

</bundles_post_ra>
